<compile_context>
chip_gen: v7x
topology: tpu7x:2x2x1
jax: 0.10.0
libtpu: 0.0.40
codegen_flags: <defaults>
</compile_context>

<pallas_src>
import jax
import jax.numpy as jnp
from jax.experimental import pallas as pl
from jax.experimental.pallas import tpu as pltpu


def _round_up(n, m):
    return ((n + m - 1) // m) * m


def _diag_mul_kernel(x_ref, d_ref, o_ref):
    # y[b, f] = x[b, f] * diag[f] — elementwise broadcast multiply in the input
    # dtype (bf16 stays bf16 on v6e/v7x; f32 path for v5e / f32 inputs).
    o_ref[...] = x_ref[...] * d_ref[...]


def diagonal_linear(x, weight, threshold=1e-4, *, block_batch=256):
    """x: (B, in_features), weight: (out_features, in_features) -> (B, out_features)."""
    B, F_in = x.shape
    F_out, F_in_w = weight.shape
    assert F_in == F_in_w, "weight in_features mismatch"
    # The eye mask in the reference module only makes sense for a square weight.
    assert F_out == F_in, "DiagonalLinear requires in_features == out_features"

    # Hoisted out of the hot path: extract the diagonal and prune at the threshold
    # once (data-independent of x).  Comparison is done in the weight's dtype.
    diag = jnp.diagonal(weight)
    diag = jnp.where(jnp.abs(diag) > threshold, diag, jnp.zeros_like(diag))
    diag = diag.astype(x.dtype)

    # Lane-dense layout: feature axis padded to a multiple of 128 lanes, batch tile
    # a multiple of 8 sublanes.  Padding is zero-filled, so padded lanes/rows just
    # produce zeros that are sliced off afterwards.
    f_pad = _round_up(F_in, 128)
    tb = min(block_batch, _round_up(B, 8))
    b_pad = _round_up(B, tb)

    x_p = jnp.pad(x, ((0, b_pad - B), (0, f_pad - F_in)))
    d_p = jnp.pad(diag, (0, f_pad - F_in)).reshape(1, f_pad)

    y_p = pl.pallas_call(
        _diag_mul_kernel,
        out_shape=jax.ShapeDtypeStruct((b_pad, f_pad), x.dtype),
        grid=(b_pad // tb,),
        in_specs=[
            pl.BlockSpec((tb, f_pad), lambda i: (i, 0)),   # x batch tile (streamed)
            pl.BlockSpec((1, f_pad), lambda i: (0, 0)),    # pruned diagonal (resident)
        ],
        out_specs=pl.BlockSpec((tb, f_pad), lambda i: (i, 0)),
        compiler_params=pltpu.CompilerParams(
            dimension_semantics=("parallel",),  # batch axis: megacore-shardable
        ),
    )(x_p, d_p)
    return y_p[:B, :F_out]


if __name__ == "__main__":
    key = jax.random.PRNGKey(0)
    k_x, k_w = jax.random.split(key)

    batch = 8
    in_features = 32
    out_features = 32  # eye mask in the module implies in_features == out_features
    threshold = 1e-4

    # Deterministic synthetic params: nn.Linear-style uniform(-1/sqrt(in), 1/sqrt(in)).
    bound = 1.0 / (in_features ** 0.5)
    weight = jax.random.uniform(
        k_w, (out_features, in_features), dtype=jnp.float32,
        minval=-bound, maxval=bound)
    # Force a couple of diagonal entries below the threshold to exercise pruning.
    weight = weight.at[0, 0].set(5e-5).at[3, 3].set(-2e-5)

    x = jax.random.normal(k_x, (batch, in_features), dtype=jnp.float32)

    y = diagonal_linear(x, weight, threshold)
    jax.block_until_ready(y)

    # Reference check in plain JAX (same semantics as the PyTorch forward).
    w_ref = weight * jnp.eye(in_features, dtype=weight.dtype)
    w_ref = w_ref * (jnp.abs(w_ref) > threshold)
    y_ref = x @ w_ref.T
    assert y.shape == y_ref.shape
    assert jnp.allclose(y, y_ref, atol=1e-5, rtol=1e-5), "mismatch vs reference"

    print("KERNEL_OK")
</pallas_src>

<mosaic_0001>
module attributes {stable_mosaic.version = 11 : i64} {
  func.func @_diag_mul_kernel(%arg0: i32, %arg1: memref<8x128xf32, #tpu.memory_space<vmem>>, %arg2: memref<1x128xf32, #tpu.memory_space<vmem>>, %arg3: memref<8x128xf32, #tpu.memory_space<vmem>>) attributes {dimension_semantics = [#tpu.dimension_semantics<parallel>], iteration_bounds = array<i64: 1>, scalar_prefetch = 0 : i64, scratch_operands = 0 : i64, tpu.core_type = #tpu.core_type<tc>, window_params = [{transform_indices = @transform_0, window_bounds = array<i64: 8, 128>}, {pipeline_mode = #tpu.pipeline_mode<synchronous>, transform_indices = @transform_1, window_bounds = array<i64: 1, 128>}, {transform_indices = @transform_2, window_bounds = array<i64: 8, 128>}]} {
    %c0 = arith.constant 0 : index
    %c0_0 = arith.constant 0 : index
    %0 = vector.load %arg1[%c0, %c0_0] : memref<8x128xf32, #tpu.memory_space<vmem>>, vector<8x128xf32>
    %c0_1 = arith.constant 0 : index
    %c0_2 = arith.constant 0 : index
    %1 = vector.load %arg2[%c0_1, %c0_2] : memref<1x128xf32, #tpu.memory_space<vmem>>, vector<1x128xf32>
    %2 = vector.broadcast %1 : vector<1x128xf32> to vector<8x128xf32>
    %3 = arith.mulf %0, %2 : vector<8x128xf32>
    %c0_3 = arith.constant 0 : index
    %c0_4 = arith.constant 0 : index
    %4 = vector.load %arg3[%c0_3, %c0_4] : memref<8x128xf32, #tpu.memory_space<vmem>>, vector<8x128xf32>
    tpu.vector_store %arg3[%c0_3, %c0_4], %3 {strides = array<i32>} : memref<8x128xf32, #tpu.memory_space<vmem>>, vector<8x128xf32>,
    return
  }
  func.func @transform_0(%arg0: i32) -> (i32, i32) {
    %c0_i32 = arith.constant 0 : i32
    %c0_i32_0 = arith.constant 0 : i32
    return %arg0, %c0_i32 : i32, i32
  }
  func.func @transform_1(%arg0: i32) -> (i32, i32) {
    %c0_i32 = arith.constant 0 : i32
    %c0_i32_0 = arith.constant 0 : i32
    %c0_i32_1 = arith.constant 0 : i32
    return %c0_i32, %c0_i32_0 : i32, i32
  }
  func.func @transform_2(%arg0: i32) -> (i32, i32) {
    %c0_i32 = arith.constant 0 : i32
    %c0_i32_0 = arith.constant 0 : i32
    return %arg0, %c0_i32 : i32, i32
  }
}

</mosaic_0001>

<bundles_post_ra>
// kernel: tpu_custom_call.1
= control target key start
LH: loop header
LB: loop body
LE: loop exit
PB: predicated region body
PF: predicated region fallthrough
CT: control target
= control target key end

     0   :  { %7 = vsyncpa [#allocation3], 0  ;;  %s144_s0 = inlined_call_operand.hbm [shape: f32[8,128], index: 0, kind: input, shape index: {}]   ;;  %s145_s1 = inlined_call_operand.vmem [shape: f32[1,128], index: 1, kind: input, shape index: {}]   ;;  %s146_s2 = inlined_call_operand.hbm [shape: f32[8,128], index: 2, kind: output, shape index: {}]  }
   0x1   :  { %8 = vsyncpa [#allocation4], 0  ;;  %s100_s9 = smov [#allocation2]   ;;  %s52_s13 = scalar_lea.hbm %s144_s0, 128 }
   0x2   :  { %s15_s10 = sshll.u32 %s100_s9, 4  ;;  %p53_p0 = scmp.ne.s32.totalorder %s144_s0, %s52_s13  ;;  %s16_s10 = int_to_ptr.vmem [resolvable:$true] %s15_s10 }
   0x3   :  { %p56_p1 = scmp.lt.u32.totalorder %s52_s13, %s144_s0 }
   0x5   :  { %p58_p2 = pnand %p56_p1, %p53_p0 }
   0x7   :  { %61 = shalt.err (!%p58_p2)
}
   0x8   :  { %s62_s18 = scalar_lea.vmem %s16_s10, 128  ;;  %p67_p4 = scmp.lt.s32.totalorder %s16_s10, %s16_s10 }
   0x9   :  { %p63_p3 = scmp.ne.s32.totalorder %s16_s10, %s62_s18  ;;  %p68_p5 = scmp.lt.s32.totalorder %s62_s18, %s62_s18 }
   0xb   :  { %p69_p6 = por %p68_p5, %p67_p4 }
   0xd   :  { %p70_p7 = pnand %p69_p6, %p63_p3 }
   0xf   :  { %73 = shalt.err (!%p70_p7)
}
  0x10   :  { %18 = dma.hbm_to_vmem [thread:$0]  %s144_s0, 128, %s16_s10, [#allocation3]  }
  0x11   :  { %96 = dma.done.wait [#allocation3], 128  }
  0x12   :  { %97 = vsyncadd [#allocation3], 4294967168  ;;  %s101_s21 = smov [#allocation5]   ;;  %v24_v0 = vld [vmem:[#allocation2] sm:$0xff] }
  0x13   :  { %s40_s22 = sshll.u32 %s101_s21, 4  ;;  %v49_v1 = vld [vmem:[%s145_s1] ss:$0 sm:$0xff]  ;;  %s41_s22 = int_to_ptr.vmem [resolvable:$true] %s40_s22 }
  0x14   :  { %v32_v2 = vmul.f32 %v49_v1, %v24_v0  ;;  %s74_s25 = scalar_lea.vmem %s41_s22, 128  ;;  %p79_p9 = scmp.lt.s32.totalorder %s41_s22, %s41_s22 }
  0x15   :  { %p75_p8 = scmp.ne.s32.totalorder %s41_s22, %s74_s25  ;;  %p80_p10 = scmp.lt.s32.totalorder %s74_s25, %s74_s25 }
  0x16   :  { %33 = vst [vmem:[#allocation5] sm:$0xff] %v32_v2 }
  0x17   :  { %p81_p11 = por %p80_p10, %p79_p9 }
  0x19   :  { %p82_p12 = pnand %p81_p11, %p75_p8 }
  0x1b   :  { %85 = shalt.err (!%p82_p12)
}
  0x1c   :  { %s86_s27 = scalar_lea.hbm %s146_s2, 128 }
  0x1d   :  { %p87_p13 = scmp.ne.s32.totalorder %s146_s2, %s86_s27  ;;  %p90_p0 = scmp.lt.u32.totalorder %s86_s27, %s146_s2 }
  0x1f   :  { %p92_p1 = pnand %p90_p0, %p87_p13 }
  0x21   :  { %95 = shalt.err (!%p92_p1)
}
  0x22   :  { %43 = dma.vmem_to_hbm [thread:$0]  %s41_s22, 128, %s146_s2, [#allocation4]  }
  0x23   :  { %98 = dma.done.wait [#allocation4], 128  }
  0x24   :  { %99 = vsyncadd [#allocation4], 4294967168 }
  0x25   :  { %47 = vsyncpa [#allocation3], 1 }
  0x26   :  { %48 = vsyncpa [#allocation4], 1 }

</bundles_post_ra>
